<compile_context>
chip_gen: v7x
topology: tpu7x:2x2x1
jax: 0.10.0
libtpu: 0.0.40
codegen_flags: <defaults>
</compile_context>

<pallas_src>
import jax
import jax.numpy as jnp
from jax import lax
from jax.experimental import pallas as pl
from jax.experimental.pallas import tpu as pltpu


def _round_up(n, m):
    return ((n + m - 1) // m) * m


def _cdiv(a, b):
    return (a + b - 1) // b


def qvalue_kernel(x_ref, w1t_ref, b1_ref, w2t_ref, b2_ref, o_ref):
    # x:   (TILE_B, ni)  (x dtype)      w1t: (nh, ni)  (x dtype)
    # b1:  (nh, 1) f32   w2t: (1, nh) f32   b2: (1, 1) f32
    # o:   (1, TILE_B)   (x dtype)
    #
    # First layer in transposed orientation (batch in the lane dimension):
    # contract dim 1 of both operands -> (nh, TILE_B).  The x "transpose"
    # happens on-chip (MXU/XLU), not as a separate XLA op over HBM.
    h = lax.dot_general(
        w1t_ref[...], x_ref[...],
        dimension_numbers=(((1,), (1,)), ((), ())),
        preferred_element_type=jnp.float32)                  # (nh, TILE_B) f32
    h = jnp.maximum(h + b1_ref[...], 0.0)                    # bias bcast over lanes
    out = jnp.dot(w2t_ref[...], h,
                  preferred_element_type=jnp.float32)        # (1, TILE_B)
    o_ref[...] = (out + b2_ref[...]).astype(o_ref.dtype)


def qvalue_forward(x, w1, b1, w2, b2, *, tile_b=65536,
                   x_vmem_budget_bytes=16 * 1024 * 1024):
    """Fused QValue forward.

    x:  (B, ni)  stateAction rows (same layout as the PyTorch module input)
    w1: (ni, nh) fc1 weight, stored transposed vs. PyTorch (in, out)
    b1: (nh,)    fc1 bias
    w2: (nh, 1)  fc2 weight (in, out)
    b2: (1,)     fc2 bias
    returns (B, 1)
    """
    B, ni = x.shape
    nh = w1.shape[1]
    dtype = x.dtype
    itemsize = jnp.dtype(dtype).itemsize

    # ---- batch tile selection ------------------------------------------
    # A (tile, ni) block lane-pads ni up to 128 in VMEM, so budget with the
    # padded width.  The Pallas pipeline double-buffers the x input.
    ni_lanes = _round_up(ni, 128)
    vmem_cap = (x_vmem_budget_bytes // 2) // (ni_lanes * itemsize)
    vmem_cap = max(128, (vmem_cap // 128) * 128)
    # Keep >=2 grid steps when the batch is big enough (v7x dual-TensorCore).
    half_b = _round_up(_cdiv(B, 2), 128)
    tile = max(128, min(tile_b, vmem_cap, half_b))

    num_blocks = _cdiv(B, tile)
    out_cols = num_blocks * tile          # output block writes never overhang

    # Explicit VMEM limit: x double-buffer + slack for weights/temporaries.
    # Raises v5e's 16 MiB scoped default when needed; stays well under v7x's
    # physical VMEM at the default budget (~24 MiB total).
    vmem_limit = 2 * tile * ni_lanes * itemsize + (8 << 20)

    # Tiny weights/biases: constant index_maps keep them VMEM-resident across
    # all grid steps.  The big-matmul weight matches x's dtype (fast MXU
    # path); bias/ReLU and the second matmul run on the f32 accumulator.
    w1t = w1.T.astype(dtype)                       # (nh, ni)
    b1c = b1.reshape(nh, 1).astype(jnp.float32)    # (nh, 1)
    w2t = w2.T.astype(jnp.float32)                 # (1, nh)
    b2c = b2.reshape(1, 1).astype(jnp.float32)     # (1, 1)

    cost = pl.CostEstimate(
        flops=2 * B * ni * nh + 2 * B * nh,
        transcendentals=0,
        bytes_accessed=(B * ni + B) * itemsize + ni * nh * itemsize
        + (2 * nh + 2) * 4,
    )

    out_t = pl.pallas_call(
        qvalue_kernel,
        out_shape=jax.ShapeDtypeStruct((1, out_cols), dtype),
        grid=(num_blocks,),
        in_specs=[
            # x streams per step; the last block may overhang past B (the
            # undefined tail columns are sliced off below).
            pl.BlockSpec((tile, ni), lambda i: (i, 0)),
            pl.BlockSpec((nh, ni), lambda i: (0, 0)),
            pl.BlockSpec((nh, 1), lambda i: (0, 0)),
            pl.BlockSpec((1, nh), lambda i: (0, 0)),
            pl.BlockSpec((1, 1), lambda i: (0, 0)),
        ],
        out_specs=pl.BlockSpec((1, tile), lambda i: (0, i)),
        compiler_params=pltpu.CompilerParams(
            dimension_semantics=("parallel",),     # shard batch across TCs (v7x)
            vmem_limit_bytes=int(vmem_limit),
        ),
        cost_estimate=cost,
    )(x, w1t, b1c, w2t, b2c)

    return out_t[:, :B].T                          # (B, 1); tiny layout op


def init_params(key, ni, nh=10, dtype=jnp.float32):
    """Deterministic init mimicking nn.Linear's U(-1/sqrt(fan_in), 1/sqrt(fan_in))."""
    k1, k2, k3, k4 = jax.random.split(key, 4)
    bound1 = 1.0 / jnp.sqrt(ni)
    bound2 = 1.0 / jnp.sqrt(nh)
    w1 = jax.random.uniform(k1, (ni, nh), dtype, -bound1, bound1)   # (in, out)
    b1 = jax.random.uniform(k2, (nh,), dtype, -bound1, bound1)
    w2 = jax.random.uniform(k3, (nh, 1), dtype, -bound2, bound2)
    b2 = jax.random.uniform(k4, (1,), dtype, -bound2, bound2)
    return w1, b1, w2, b2


def _reference(x, w1, b1, w2, b2):
    return jnp.maximum(x @ w1 + b1[None, :], 0.0) @ w2 + b2[None, :]


if __name__ == "__main__":
    key = jax.random.PRNGKey(0)
    ni, nh = 32, 10
    kx, kp, kx2, kx3 = jax.random.split(key, 4)
    w1, b1, w2, b2 = init_params(kp, ni, nh)

    # Small batch (single RL transition batch): 1 grid step, heavy overhang.
    B = 8
    x = jax.random.normal(kx, (B, ni), jnp.float32)
    out = jax.block_until_ready(qvalue_forward(x, w1, b1, w2, b2))
    ref = _reference(x, w1, b1, w2, b2)
    assert out.shape == (B, 1)
    assert jnp.allclose(out, ref, atol=1e-4, rtol=1e-4)

    # Non-multiple batch: 2 grid steps with an overhanging last x block.
    B2 = 300
    x2 = jax.random.normal(kx2, (B2, ni), jnp.float32)
    out2 = jax.block_until_ready(qvalue_forward(x2, w1, b1, w2, b2))
    ref2 = _reference(x2, w1, b1, w2, b2)
    assert out2.shape == (B2, 1)
    assert jnp.allclose(out2, ref2, atol=1e-4, rtol=1e-4)

    # Larger, exactly-tiled batch (2 grid steps, no overhang).
    B3 = 4096
    x3 = jax.random.normal(kx3, (B3, ni), jnp.float32)
    out3 = jax.block_until_ready(qvalue_forward(x3, w1, b1, w2, b2))
    ref3 = _reference(x3, w1, b1, w2, b2)
    assert out3.shape == (B3, 1)
    assert jnp.allclose(out3, ref3, atol=1e-4, rtol=1e-4)

    # bf16 streaming path (halves the dominant HBM stream; f32 accumulation).
    out_bf16 = jax.block_until_ready(
        qvalue_forward(x3.astype(jnp.bfloat16), w1, b1, w2, b2))
    assert out_bf16.shape == (B3, 1)
    assert jnp.allclose(out_bf16.astype(jnp.float32), ref3, atol=5e-2, rtol=5e-2)

    print("KERNEL_OK")
</pallas_src>

<mosaic_0001>
module attributes {stable_mosaic.version = 11 : i64} {
  func.func @qvalue_kernel(%arg0: i32, %arg1: memref<128x32xf32, #tpu.memory_space<vmem>>, %arg2: memref<10x32xf32, #tpu.memory_space<vmem>>, %arg3: memref<10x1xf32, #tpu.memory_space<vmem>>, %arg4: memref<1x10xf32, #tpu.memory_space<vmem>>, %arg5: memref<1x1xf32, #tpu.memory_space<vmem>>, %arg6: memref<1x128xf32, #tpu.memory_space<vmem>>) attributes {dimension_semantics = [#tpu.dimension_semantics<parallel>], iteration_bounds = array<i64: 1>, scalar_prefetch = 0 : i64, scratch_operands = 0 : i64, tpu.core_type = #tpu.core_type<tc>, window_params = [{transform_indices = @transform_0, window_bounds = array<i64: 128, 32>}, {pipeline_mode = #tpu.pipeline_mode<synchronous>, transform_indices = @transform_1, window_bounds = array<i64: 10, 32>}, {pipeline_mode = #tpu.pipeline_mode<synchronous>, transform_indices = @transform_2, window_bounds = array<i64: 10, 1>}, {pipeline_mode = #tpu.pipeline_mode<synchronous>, transform_indices = @transform_3, window_bounds = array<i64: 1, 10>}, {pipeline_mode = #tpu.pipeline_mode<synchronous>, transform_indices = @transform_4, window_bounds = array<i64: 1, 1>}, {transform_indices = @transform_5, window_bounds = array<i64: 1, 128>}]} {
    %c0 = arith.constant 0 : index
    %c0_0 = arith.constant 0 : index
    %0 = vector.load %arg2[%c0, %c0_0] : memref<10x32xf32, #tpu.memory_space<vmem>>, vector<10x32xf32>
    %c0_1 = arith.constant 0 : index
    %c0_2 = arith.constant 0 : index
    %1 = vector.load %arg1[%c0_1, %c0_2] : memref<128x32xf32, #tpu.memory_space<vmem>>, vector<128x32xf32>
    %cst = arith.constant dense<0.000000e+00> : vector<10x128xf32>
    %2 = tpu.matmul %0, %1, %cst {dimension_numbers = #tpu.dot_dimension_numbers<[1], [1], [0], [0], [0, 0, 1, 0], [], []>} : vector<10x32xf32>, vector<128x32xf32>, vector<10x128xf32> -> vector<10x128xf32>
    %c0_3 = arith.constant 0 : index
    %c0_4 = arith.constant 0 : index
    %3 = vector.load %arg3[%c0_3, %c0_4] : memref<10x1xf32, #tpu.memory_space<vmem>>, vector<10x1xf32>
    %4 = vector.broadcast %3 : vector<10x1xf32> to vector<10x128xf32>
    %5 = arith.addf %2, %4 : vector<10x128xf32>
    %cst_5 = arith.constant 0.000000e+00 : f32
    %6 = vector.broadcast %cst_5 : f32 to vector<10x128xf32>
    %7 = arith.maximumf %5, %6 : vector<10x128xf32>
    %c0_6 = arith.constant 0 : index
    %c0_7 = arith.constant 0 : index
    %8 = vector.load %arg4[%c0_6, %c0_7] : memref<1x10xf32, #tpu.memory_space<vmem>>, vector<1x10xf32>
    %cst_8 = arith.constant dense<0.000000e+00> : vector<1x128xf32>
    %9 = tpu.matmul %8, %7, %cst_8 {dimension_numbers = #tpu.dot_dimension_numbers<[1], [0], [0], [1], [0, 0, 1, 1], [], []>} : vector<1x10xf32>, vector<10x128xf32>, vector<1x128xf32> -> vector<1x128xf32>
    %c0_9 = arith.constant 0 : index
    %c0_10 = arith.constant 0 : index
    %10 = vector.load %arg5[%c0_9, %c0_10] : memref<1x1xf32, #tpu.memory_space<vmem>>, vector<1x1xf32>
    %11 = vector.broadcast %10 : vector<1x1xf32> to vector<1x128xf32>
    %12 = arith.addf %9, %11 : vector<1x128xf32>
    %c0_11 = arith.constant 0 : index
    %c0_12 = arith.constant 0 : index
    %13 = vector.load %arg6[%c0_11, %c0_12] : memref<1x128xf32, #tpu.memory_space<vmem>>, vector<1x128xf32>
    tpu.vector_store %arg6[%c0_11, %c0_12], %12 {strides = array<i32>} : memref<1x128xf32, #tpu.memory_space<vmem>>, vector<1x128xf32>,
    return
  }
  func.func @transform_0(%arg0: i32) -> (i32, i32) {
    %c0_i32 = arith.constant 0 : i32
    %c0_i32_0 = arith.constant 0 : i32
    return %arg0, %c0_i32 : i32, i32
  }
  func.func @transform_1(%arg0: i32) -> (i32, i32) {
    %c0_i32 = arith.constant 0 : i32
    %c0_i32_0 = arith.constant 0 : i32
    %c0_i32_1 = arith.constant 0 : i32
    return %c0_i32, %c0_i32_0 : i32, i32
  }
  func.func @transform_2(%arg0: i32) -> (i32, i32) {
    %c0_i32 = arith.constant 0 : i32
    %c0_i32_0 = arith.constant 0 : i32
    %c0_i32_1 = arith.constant 0 : i32
    return %c0_i32, %c0_i32_0 : i32, i32
  }
  func.func @transform_3(%arg0: i32) -> (i32, i32) {
    %c0_i32 = arith.constant 0 : i32
    %c0_i32_0 = arith.constant 0 : i32
    %c0_i32_1 = arith.constant 0 : i32
    return %c0_i32, %c0_i32_0 : i32, i32
  }
  func.func @transform_4(%arg0: i32) -> (i32, i32) {
    %c0_i32 = arith.constant 0 : i32
    %c0_i32_0 = arith.constant 0 : i32
    %c0_i32_1 = arith.constant 0 : i32
    return %c0_i32, %c0_i32_0 : i32, i32
  }
  func.func @transform_5(%arg0: i32) -> (i32, i32) {
    %c0_i32 = arith.constant 0 : i32
    %c0_i32_0 = arith.constant 0 : i32
    return %c0_i32, %arg0 : i32, i32
  }
}

</mosaic_0001>

<bundles_post_ra>
// kernel: tpu_custom_call.1
= control target key start
LH: loop header
LB: loop body
LE: loop exit
PB: predicated region body
PF: predicated region fallthrough
CT: control target
= control target key end

     0   :  { %s610_s0 = inlined_call_operand.vmem [shape: f32[8,32], index: 0, kind: input, shape index: {}]   ;;  %s611_s1 = inlined_call_operand.vmem [shape: f32[10,32], index: 1, kind: input, shape index: {}]   ;;  %s612_s2 = inlined_call_operand.vmem [shape: f32[10,1], index: 2, kind: input, shape index: {}]   ;;  %s613_s3 = inlined_call_operand.vmem [shape: f32[1,10], index: 3, kind: input, shape index: {}]   ;;  %s614_s4 = inlined_call_operand.<no memory space> [shape: f32[1,1], index: 4, kind: input, shape index: {}]   ;;  %s615_s5 = inlined_call_operand.hbm [shape: f32[1,128], index: 5, kind: output, shape index: {}]  }
   0x1   :  { %v10_v0 = vstv %s614_s4 }
   0x2   :  { %11 = vst [vmem:[#allocation2] sm:$0x1] %v10_v0 }
   0x3   :  { %v25_v1 = vld [vmem:[%s610_s0] sm:$0xff]  ;;  %v26_v2 = vld [vmem:[%s610_s0 + $0x8] sm:$0xff]  ;;  %vm53_vm0 = vcmask 261120   ;;  %v27_v3 = vld [vmem:[%s610_s0 + $0x10] sm:$0xff]  ;;  %v456_v7 = vmov 0  }
   0x4   :  { %v372_v4 = vpack.c.bf16 %v26_v2, %v25_v1  ;;  %vm506_vm1 = vmpackc.low %vm53_vm0, %vm53_vm0  ;;  %v28_v6 = vld [vmem:[%s610_s0 + $0x18] sm:$0xff]  ;;  %430 = vset.pattern.permute.xlu0 %v456_v7  ;;  %431 = vset.pattern.permute.xlu1 %v456_v7  ;;  %v23_v9 = vld [vmem:[%s611_s1] sm:$0xff] }
   0x5   :  { %v378_v8 = vpack.c.bf16 %v28_v6, %v27_v3  ;;  %v29_v10 = vld [vmem:[%s610_s0 + $0x20] sm:$0xff]  ;;  %v30_v11 = vld [vmem:[%s610_s0 + $0x28] sm:$0xff]  ;;  %362 = vmatprep.mubr.msk.f32.mxu0 %vm53_vm0, %v23_v9 }
   0x6   :  { %374 = vmatprep.subr.msk.bf16.mxu0 %vm506_vm1, %v372_v4  ;;  %v41_v12 = vld [vmem:[%s612_s2] sm:$0xff] }
   0x7   :  { %377 = vmatpush3.bf16.xpose.msk.msra.mxu0 %vm506_vm1, %v372_v4  ;;  %45 = vperm.xlu0 %430, %v41_v12  }
   0x8   :  { %380 = vmatprep.subr.msk.bf16.mxu0 %vm506_vm1, %v378_v8 }
   0x9   :  { %12 = vsyncpa [#allocation4], 0  ;;  %v42_v13 = vld [vmem:[%s612_s2 + $0x8] sm:$0x3]  ;;  %v384_v14 = vpack.c.bf16 %v30_v11, %v29_v10  ;;  %v31_v15 = vld [vmem:[%s610_s0 + $0x30] sm:$0xff]  ;;  %v457_v31 = vmov 0.0|0.0   ;;  %v192_v44 = vlaneseq }
   0xa   :  { %v32_v16 = vld [vmem:[%s610_s0 + $0x38] sm:$0xff]  ;;  %v33_v18 = vld [vmem:[%s610_s0 + $0x40] sm:$0xff]  ;;  %v34_v19 = vld [vmem:[%s610_s0 + $0x48] sm:$0xff]  ;;  %420 = vmatprep.subr.bf16.mxu1 %v457_v31  ;;  %vm458_vm2 = vmmov 0   ;;  %v459_v32 = vmov 0.0   ;;  %vm200_vm3 = vcmask 1041408  }
   0xb   :  { %50 = vperm.xlu0 %430, %v42_v13   ;;  %v390_v17 = vpack.c.bf16 %v32_v16, %v31_v15  ;;  %v396_v20 = vpack.c.bf16 %v34_v19, %v33_v18  ;;  %v35_v21 = vld [vmem:[%s610_s0 + $0x50] sm:$0xff]  ;;  %v36_v22 = vld [vmem:[%s610_s0 + $0x58] sm:$0xff]  ;;  %v37_v24 = vld [vmem:[%s610_s0 + $0x60] sm:$0xff]  ;;  %369 = vmatprep.mubr.msk.f32.mxu1 %vm458_vm2, %v459_v32  ;;  %vm460_vm4 = vmmov 1   ;;  %vm196_vm6 = vcmask 80896   ;;  %s461_s7 = smov [#allocation3]  }
   0xc   :  { %v402_v23 = vpack.c.bf16 %v36_v22, %v35_v21  ;;  %v38_v25 = vld [vmem:[%s610_s0 + $0x68] sm:$0xff]  ;;  %v39_v27 = vld [vmem:[%s610_s0 + $0x70] sm:$0xff]  ;;  %v40_v28 = vld [vmem:[%s610_s0 + $0x78] sm:$0xff]  ;;  %v193_v45 = vshrl.u32 %v192_v44, 7  ;;  %s281_s8 = sshll.u32 %s461_s7, 4  ;;  %s282_s8 = int_to_ptr.vmem [resolvable:$true] %s281_s8 }
   0xd   :  { %v408_v26 = vpack.c.bf16 %v38_v25, %v37_v24  ;;  %v414_v29 = vpack.c.bf16 %v40_v28, %v39_v27  ;;  %v24_v30 = vld [vmem:[%s611_s1 + $0x8] sm:$0x3]  ;;  %v186_v33 = vld [vmem:[#allocation2] sm:$0x1]  ;;  %vm422_vm5 = vmpackc.low %vm200_vm3, %vm460_vm4  ;;  %s432_s9 = scalar_lea.vmem %s282_s8, 16  ;;  %s436_s10 = scalar_lea.vmem %s282_s8, 32 }
   0xe   :  { %189 = vperm.xlu1 %431, %v186_v33   ;;  %v185_v43 = vld [vmem:[%s613_s3] sm:$0x1]  ;;  %v194_v46 = vsub.s32 0, %v193_v45  ;;  %p433_p0 = scmp.ne.s32.totalorder %s282_s8, %s432_s9  ;;  %p437_p1 = scmp.lt.s32.totalorder %s282_s8, %s282_s8 }
   0xf   :  { %383 = vmatpush3.bf16.xpose.msk.msra.mxu0 %vm506_vm1, %v378_v8  ;;  %p438_p2 = scmp.lt.s32.totalorder %s436_s10, %s432_s9 }
  0x10   :  { %386 = vmatprep.subr.msk.bf16.mxu0 %vm506_vm1, %v384_v14 }
  0x11   :  { %p439_p3 = por %p438_p2, %p437_p1 }
  0x13   :  { %p440_p4 = pnand %p439_p3, %p433_p0 }
  0x17   :  { %389 = vmatpush3.bf16.xpose.msk.msra.mxu0 %vm506_vm1, %v384_v14 }
  0x18   :  { %392 = vmatprep.subr.msk.bf16.mxu0 %vm506_vm1, %v390_v17 }
  0x1f   :  { %395 = vmatpush3.bf16.xpose.msk.msra.mxu0 %vm506_vm1, %v390_v17 }
  0x20   :  { %398 = vmatprep.subr.msk.bf16.mxu0 %vm506_vm1, %v396_v20 }
  0x27   :  { %401 = vmatpush3.bf16.xpose.msk.msra.mxu0 %vm506_vm1, %v396_v20 }
  0x28   :  { %404 = vmatprep.subr.msk.bf16.mxu0 %vm506_vm1, %v402_v23 }
  0x2f   :  { %407 = vmatpush3.bf16.xpose.msk.msra.mxu0 %vm506_vm1, %v402_v23 }
  0x30   :  { %410 = vmatprep.subr.msk.bf16.mxu0 %vm506_vm1, %v408_v26 }
  0x37   :  { %413 = vmatpush3.bf16.xpose.msk.msra.mxu0 %vm506_vm1, %v408_v26 }
  0x38   :  { %416 = vmatprep.subr.msk.bf16.mxu0 %vm506_vm1, %v414_v29 }
  0x3f   :  { %419 = vmatpush3.bf16.xpose.msk.msra.mxu0 %vm506_vm1, %v414_v29 }
  0x46   :  { %363 = vmatmul.mubr.msk.f32.vlgmr.msra.gmra.mrb[0].mxu0 %vm53_vm0, %v24_v30 }
  0x86   :  { %v46_v34 = vpop.permute.xlu0 %45 }
  0x8a   :  { %v51_v35 = vpop.permute.xlu0 %50 }
  0x8d   :  { %v190_v47 = vpop.permute.xlu1 %189 }
  0x8e   :  { %v195_v48 = vrot.slane %v190_v47, %v194_v46 }
 0x119   :  { %v364_v36 = vpop.f32.mrb[0].mxu0 }
 0x11a   :  { %v180_v37 = vadd.f32 %v364_v36, %v51_v35  ;;  %v174_v38 = vpop.f32.mrb[1].mxu0 }
 0x11b   :  { %v175_v39 = vadd.f32 %v174_v38, %v46_v34 }
 0x11c   :  { %v184_v40 = vmax.f32 %v180_v37, 0.0 }
 0x11d   :  { %v183_v41 = vmax.f32 %v175_v39, 0.0 }
 0x11f   :  { %v421_v42 = vpack.c.bf16 %v184_v40, %v183_v41 }
 0x121   :  { %423 = vmatpush3.bf16.msk.msra.mxu1 %vm422_vm5, %v421_v42 }
 0x124   :  { %370 = vmatmul.mubr.msk.f32.vlgmr.msra.gmra.mrb[0].mxu1 %vm196_vm6, %v185_v43 }
 0x1f7   :  { %v270_v49 = vpop.f32.mrb[0].mxu1 }
 0x1f8   :  { %v271_v50 = vadd.f32 %v270_v49, %v195_v48  ;;  %v371_v51 = vpop.f32.mrb[1].mxu1 }
 0x1fa   :  { %274 = vst [vmem:[#allocation3] sm:$0x1] %v271_v50 }
 0x1fb   :  { %443 = shalt.err (!%p440_p4)
}
 0x1fc   :  { %s444_s12 = scalar_lea.hbm %s615_s5, 16 }
 0x1fd   :  { %p445_p5 = scmp.ne.s32.totalorder %s615_s5, %s444_s12  ;;  %p448_p6 = scmp.lt.u32.totalorder %s444_s12, %s615_s5 }
 0x1ff   :  { %p450_p7 = pnand %p448_p6, %p445_p5 }
 0x201   :  { %453 = shalt.err (!%p450_p7)
}
 0x202   :  { %284 = dma.vmem_to_hbm [thread:$0]  %s282_s8, 16, %s615_s5, [#allocation4]  }
 0x203   :  { %454 = dma.done.wait [#allocation4], 16  }
 0x204   :  { %455 = vsyncadd [#allocation4], 4294967280 }
 0x205   :  { %288 = vsyncpa [#allocation4], 1 }

</bundles_post_ra>
